<compile_context>
chip_gen: v6e
topology: v6e:2x2x1
jax: 0.10.0
libtpu: 0.0.40
codegen_flags: <defaults>
</compile_context>

<pallas_src>
import functools

import jax
import jax.numpy as jnp
from jax import lax
from jax.experimental import pallas as pl
from jax.experimental.pallas import tpu as pltpu


def _round_up(v, m):
    return (v + m - 1) // m * m


def _fused_textcnn_kernel(x_ref, w_ref, b_ref, o_ref, *,
                          filter_sizes, f_pad, t_valids):
    # x_ref : (B_TILE, S_pad, E)
    # w_ref : (E, N_total) with N_total = sum(fs) * F_pad; the column group of
    #         (branch j, tap i) sits at a 128-aligned offset.
    # b_ref : (1, NB * F_pad)  (f32, zero-padded)
    # o_ref : (B_TILE, NB * F_pad)
    x = x_ref[...]
    bt, s, e = x.shape
    m = bt * s
    xm = x.reshape(m, e)              # fold batch + time into the matmul M dim

    # ONE consolidated MXU matmul for every (branch, tap).
    acc_all = jnp.dot(xm, w_ref[...], preferred_element_type=jnp.float32)

    # Time index per row, broadcastable; hoisted out of the branch loop.
    t_idx = lax.broadcasted_iota(jnp.int32, (bt, s, 1), 1)

    col = 0
    for j, fs in enumerate(filter_sizes):
        # Accumulate taps: tap i's result is shifted up by i rows so it lands
        # on conv-output row t (roll by -i == roll by m - i, sublane axis/XLU).
        acc = acc_all[:, col:col + f_pad]
        col += f_pad
        for i in range(1, fs):
            acc = acc + pltpu.roll(acc_all[:, col:col + f_pad],
                                   shift=m - i, axis=0)
            col += f_pad

        # Mask with -inf BEFORE the max. This covers t >= t_valid, rows whose
        # roll wrapped across a batch boundary, and zero-padded time rows, and
        # stays exact for any monotone activation (not only ReLU).
        z = jnp.where(t_idx < t_valids[j],
                      acc.reshape(bt, s, f_pad), -jnp.inf)
        pooled = jnp.max(z, axis=1)                               # (B_TILE, F_pad)
        # Bias is time-invariant -> add after the max; ReLU is monotone ->
        # relu(max(.)) == max(relu(.)). Both now run on (B_TILE, F_pad) only.
        pooled = pooled + b_ref[:, j * f_pad:(j + 1) * f_pad]
        o_ref[:, j * f_pad:(j + 1) * f_pad] = (
            jnp.maximum(pooled, 0.0).astype(o_ref.dtype))


def _vmem_capacity_bytes():
    try:
        info = pltpu.get_tpu_info()
        cap = getattr(info, "vmem_capacity_bytes", None)
        if cap:
            return int(cap)
    except Exception:
        pass
    # Conservative fallback = v7x per-TensorCore VMEM (v5e/v6e have 128 MiB).
    return 64 << 20


def _estimate_vmem_bytes(bt, s_pad, e, f_pad, n_total, nb,
                         x_itemsize, w_itemsize, out_itemsize):
    """Whole-plan VMEM estimate: double-buffered pipeline blocks + in-kernel
    f32 intermediates (consolidated matmul result + per-branch temps)."""
    m = bt * s_pad
    dbuf = 2
    fixed = dbuf * e * n_total * w_itemsize + dbuf * nb * f_pad * 4
    per_tile = (dbuf * bt * s_pad * e * x_itemsize        # x tile (in)
                + dbuf * bt * nb * f_pad * out_itemsize   # output block
                + m * e * 4                               # xm (if materialized)
                + m * n_total * 4                         # consolidated matmul result
                + 4 * m * f_pad * 4)                      # roll/acc/mask temps
    return fixed + per_tile


def _pick_batch_tile(batch, est, s_pad, vmem_budget, target_rows=1024):
    """Largest useful divisor of `batch` whose full VMEM plan fits the budget.
    Keeps the output block sublane-legal (multiple of 8 or the full batch) and
    prefers >= 2 grid steps so both v7x TensorCores get work."""
    cands = []
    for bt in range(1, min(batch, 4096) + 1):
        if batch % bt != 0:
            continue
        if bt % 8 != 0 and bt != batch:
            continue
        if est(bt) > vmem_budget:
            continue
        cands.append(bt)
    if not cands:
        # Nothing fits the plan; fall back to the smallest layout-legal tile
        # (vmem_limit_bytes is raised to cover its estimate in the wrapper).
        return 8 if batch % 8 == 0 else batch
    split = [bt for bt in cands if bt <= batch // 2]
    pool = split if split else cands
    for bt in pool:                        # ascending: smallest tile reaching
        if bt * s_pad >= target_rows:      # the folded-M row target
            return bt
    return max(pool)


def textcnn_conv2d_layers(x_nchw, weights, biases, filter_sizes, *,
                          batch_tile=None, compute_dtype=None,
                          target_rows=1024):
    """Forward pass of Conv2dLayers.

    x_nchw : (B, 1, S, E)                 (PyTorch NCHW layout, C=1)
    weights: list of (fs, E, F) arrays    (transposed PyTorch conv weights)
    biases : list of (F,) arrays
    returns: (B, F * len(filter_sizes))   == h_pool_flat
    """
    B, C, S, E = x_nchw.shape
    assert C == 1
    nb = len(filter_sizes)
    assert nb >= 1 and S >= max(filter_sizes), "sequence shorter than filter"
    F = weights[0].shape[-1]
    for fs, w, b in zip(filter_sizes, weights, biases):
        assert w.shape == (fs, E, F), (w.shape, (fs, E, F))   # shared num_filters
        assert b.shape == (F,), b.shape

    out_dtype = x_nchw.dtype
    x = x_nchw[:, 0, :, :]                                    # (B, S, E)
    if compute_dtype is not None:
        # bf16 input streaming helps on v5e too (HBM-bound); accum stays f32.
        x = x.astype(compute_dtype)
        weights = [w.astype(compute_dtype) for w in weights]
    x_itemsize = jnp.dtype(x.dtype).itemsize
    w_itemsize = jnp.dtype(weights[0].dtype).itemsize
    out_itemsize = jnp.dtype(out_dtype).itemsize

    # Pad time to the sublane tile so the (bt,S,E)<->(bt*S,E) folds inside the
    # kernel are layout no-ops; padded rows are masked in-kernel.
    sublane = 32 // x_itemsize            # 8 for f32, 16 for bf16
    S_pad = _round_up(S, sublane)
    if S_pad != S:
        x = jnp.pad(x, ((0, 0), (0, S_pad - S), (0, 0)))

    # Pad F to a multiple of 128: every (branch, tap) column group, bias slice
    # and output store becomes 128-aligned / lane-dense. Stripped after call.
    F_pad = _round_up(F, 128)
    n_taps = sum(filter_sizes)
    N_total = n_taps * F_pad
    F_out = nb * F_pad

    w_cols = []
    for fs, w in zip(filter_sizes, weights):
        wp = jnp.pad(w, ((0, 0), (0, 0), (0, F_pad - F)))     # (fs, E, F_pad)
        for i in range(fs):
            w_cols.append(wp[i])
    w_all = jnp.concatenate(w_cols, axis=1)                   # (E, N_total)

    b_all = jnp.concatenate(
        [jnp.pad(b.astype(jnp.float32), (0, F_pad - F)) for b in biases]
    ).reshape(1, F_out)                                       # (1, nb*F_pad)

    # Per-generation VMEM plan (v7x: 64 MiB/TC; v5e/v6e: 128 MiB).
    vmem_cap = _vmem_capacity_bytes()
    vmem_budget = min(int(vmem_cap * 3 // 4), 96 << 20)

    def est(bt):
        return _estimate_vmem_bytes(bt, S_pad, E, F_pad, N_total, nb,
                                    x_itemsize, w_itemsize, out_itemsize)

    if batch_tile is None:
        batch_tile = _pick_batch_tile(B, est, S_pad, vmem_budget, target_rows)
    assert B % batch_tile == 0
    assert batch_tile % 8 == 0 or batch_tile == B
    vmem_limit = int(min(max(vmem_budget, est(batch_tile) + (4 << 20)),
                         vmem_cap - (2 << 20)))

    t_valids = tuple(S - fs + 1 for fs in filter_sizes)       # original S
    kernel = functools.partial(_fused_textcnn_kernel,
                               filter_sizes=tuple(filter_sizes),
                               f_pad=F_pad, t_valids=t_valids)

    flops = 2 * B * S * E * F * n_taps
    bytes_accessed = (x.size * x_itemsize + w_all.size * w_itemsize
                      + b_all.size * 4 + B * F_out * out_itemsize)

    out_padded = pl.pallas_call(
        kernel,
        out_shape=jax.ShapeDtypeStruct((B, F_out), out_dtype),
        grid_spec=pltpu.PrefetchScalarGridSpec(
            num_scalar_prefetch=0,
            grid=(B // batch_tile,),
            in_specs=[
                pl.BlockSpec((batch_tile, S_pad, E), lambda i: (i, 0, 0)),
                # Grid-invariant weight/bias blocks (no per-step refetch).
                pl.BlockSpec((E, N_total), lambda i: (0, 0)),
                pl.BlockSpec((1, F_out), lambda i: (0, 0)),
            ],
            out_specs=pl.BlockSpec((batch_tile, F_out), lambda i: (i, 0)),
        ),
        compiler_params=pltpu.CompilerParams(
            dimension_semantics=("parallel",),
            vmem_limit_bytes=vmem_limit,
        ),
        cost_estimate=pl.CostEstimate(flops=flops, transcendentals=0,
                                      bytes_accessed=bytes_accessed),
    )(x, w_all, b_all)

    if F_pad == F:
        return out_padded
    return out_padded.reshape(B, nb, F_pad)[:, :, :F].reshape(B, nb * F)


def _reference_forward(x_nchw, weights, biases, filter_sizes):
    """Pure-JAX reference mirroring the PyTorch module (for verification)."""
    B, _, S, E = x_nchw.shape
    x = x_nchw[:, 0, :, :]
    outs = []
    for fs, w, b in zip(filter_sizes, weights, biases):
        T = S - fs + 1
        windows = jnp.stack([x[:, i:i + T, :] for i in range(fs)], axis=2)  # (B,T,fs,E)
        scores = jnp.einsum("btie,ief->btf", windows, w) + b[None, None, :]
        h = jnp.maximum(scores, 0.0)
        outs.append(jnp.max(h, axis=1))                                     # (B,F)
    return jnp.concatenate(outs, axis=1)


if __name__ == "__main__":
    # Small, TextCNN-consistent config (3 filter sizes => torch.cat dim=3 valid).
    batch = 2
    sequence_length = 16
    embedding_size = 32
    num_filters = 8
    filter_sizes = [2, 3, 4]

    key = jax.random.PRNGKey(0)
    kx, *kws = jax.random.split(key, 1 + 2 * len(filter_sizes))

    # Input in PyTorch NCHW layout: (B, 1, S, E)
    x = jax.random.normal(kx, (batch, 1, sequence_length, embedding_size),
                          dtype=jnp.float32)

    weights, biases = [], []
    for j, fs in enumerate(filter_sizes):
        kw, kb = kws[2 * j], kws[2 * j + 1]
        # Equivalent to PyTorch Conv2d weight (num_filters, 1, fs, E), stored
        # transposed as (fs, E, num_filters) for the kernel's matmul layout.
        weights.append(0.1 * jax.random.normal(
            kw, (fs, embedding_size, num_filters), dtype=jnp.float32))
        biases.append(0.1 * jax.random.normal(
            kb, (num_filters,), dtype=jnp.float32))

    # f32 compute keeps the correctness check tight; pass
    # compute_dtype=jnp.bfloat16 for the memory-bound ~2x win on v5e/v6e/v7x.
    out = textcnn_conv2d_layers(x, weights, biases, filter_sizes)
    out = jax.block_until_ready(out)

    expected_cols = num_filters * len(filter_sizes)
    assert out.shape == (batch, expected_cols), out.shape

    ref = _reference_forward(x, weights, biases, filter_sizes)
    assert jnp.allclose(out, ref, atol=1e-4, rtol=1e-4), (
        float(jnp.max(jnp.abs(out - ref))))

    print("KERNEL_OK")
</pallas_src>

<mosaic_0001>
module attributes {stable_mosaic.version = 11 : i64} {
  func.func @_fused_textcnn_kernel(%arg0: i32, %arg1: memref<2x16x32xf32, #tpu.memory_space<vmem>>, %arg2: memref<32x1152xf32, #tpu.memory_space<vmem>>, %arg3: memref<1x384xf32, #tpu.memory_space<vmem>>, %arg4: memref<2x384xf32, #tpu.memory_space<vmem>>) attributes {dimension_semantics = [#tpu.dimension_semantics<parallel>], iteration_bounds = array<i64: 1>, scalar_prefetch = 0 : i64, scratch_operands = 0 : i64, tpu.core_type = #tpu.core_type<tc>, window_params = [{transform_indices = @transform_0, window_bounds = array<i64: 2, 16, 32>}, {pipeline_mode = #tpu.pipeline_mode<synchronous>, transform_indices = @transform_1, window_bounds = array<i64: 32, 1152>}, {pipeline_mode = #tpu.pipeline_mode<synchronous>, transform_indices = @transform_2, window_bounds = array<i64: 1, 384>}, {transform_indices = @transform_3, window_bounds = array<i64: 2, 384>}]} {
    %c0 = arith.constant 0 : index
    %c0_0 = arith.constant 0 : index
    %c0_1 = arith.constant 0 : index
    %0 = vector.load %arg1[%c0, %c0_0, %c0_1] : memref<2x16x32xf32, #tpu.memory_space<vmem>>, vector<2x16x32xf32>
    %1 = vector.shape_cast %0 : vector<2x16x32xf32> to vector<32x32xf32>
    %c0_2 = arith.constant 0 : index
    %c0_3 = arith.constant 0 : index
    %2 = vector.load %arg2[%c0_2, %c0_3] : memref<32x1152xf32, #tpu.memory_space<vmem>>, vector<32x1152xf32>
    %cst = arith.constant dense<0.000000e+00> : vector<32x1152xf32>
    %3 = tpu.matmul %1, %2, %cst {dimension_numbers = #tpu.dot_dimension_numbers<[1], [0], [0], [1], [0, 0, 1, 1], [], []>} : vector<32x32xf32>, vector<32x1152xf32>, vector<32x1152xf32> -> vector<32x1152xf32>
    %4 = tpu.iota {dimensions = array<i32: 1>} : vector<2x16x1xi32>
    %5 = vector.extract_strided_slice %3 {offsets = [0, 0], sizes = [32, 128], strides = [1, 1]} : vector<32x1152xf32> to vector<32x128xf32>
    %6 = vector.extract_strided_slice %3 {offsets = [0, 128], sizes = [32, 128], strides = [1, 1]} : vector<32x1152xf32> to vector<32x128xf32>
    %c31_i32 = arith.constant 31 : i32
    %7 = tpu.dynamic_rotate %6 by %c31_i32 dim 0 : vector<32x128xf32>, i32 -> vector<32x128xf32>
    %8 = arith.addf %5, %7 : vector<32x128xf32>
    %c15_i32 = arith.constant 15 : i32
    %9 = vector.broadcast %c15_i32 : i32 to vector<2x16x1xi32>
    %10 = arith.cmpi slt, %4, %9 : vector<2x16x1xi32>
    %11 = vector.shape_cast %8 : vector<32x128xf32> to vector<2x16x128xf32>
    %cst_4 = arith.constant 0xFF800000 : f32
    %12 = vector.shape_cast %10 : vector<2x16x1xi1> to vector<2x16x1xi1>
    %13 = vector.broadcast %12 : vector<2x16x1xi1> to vector<2x16x128xi1>
    %14 = vector.broadcast %cst_4 : f32 to vector<2x16x128xf32>
    %15 = arith.select %13, %11, %14 : vector<2x16x128xi1>, vector<2x16x128xf32>
    %cst_5 = arith.constant dense<0xFF800000> : vector<2x128xf32>
    %16 = vector.multi_reduction <maximumf>, %15, %cst_5 [1] : vector<2x16x128xf32> to vector<2x128xf32>
    %c0_6 = arith.constant 0 : index
    %c0_7 = arith.constant 0 : index
    %17 = vector.load %arg3[%c0_6, %c0_7] : memref<1x384xf32, #tpu.memory_space<vmem>>, vector<1x128xf32>
    %18 = vector.broadcast %17 : vector<1x128xf32> to vector<2x128xf32>
    %19 = arith.addf %16, %18 : vector<2x128xf32>
    %cst_8 = arith.constant 0.000000e+00 : f32
    %20 = vector.broadcast %cst_8 : f32 to vector<2x128xf32>
    %21 = arith.maximumf %19, %20 : vector<2x128xf32>
    %c0_9 = arith.constant 0 : index
    %c0_10 = arith.constant 0 : index
    %22 = vector.load %arg4[%c0_9, %c0_10] : memref<2x384xf32, #tpu.memory_space<vmem>>, vector<2x128xf32>
    tpu.vector_store %arg4[%c0_9, %c0_10], %21 {strides = array<i32>} : memref<2x384xf32, #tpu.memory_space<vmem>>, vector<2x128xf32>,
    %23 = vector.extract_strided_slice %3 {offsets = [0, 256], sizes = [32, 128], strides = [1, 1]} : vector<32x1152xf32> to vector<32x128xf32>
    %24 = vector.extract_strided_slice %3 {offsets = [0, 384], sizes = [32, 128], strides = [1, 1]} : vector<32x1152xf32> to vector<32x128xf32>
    %c31_i32_11 = arith.constant 31 : i32
    %25 = tpu.dynamic_rotate %24 by %c31_i32_11 dim 0 : vector<32x128xf32>, i32 -> vector<32x128xf32>
    %26 = arith.addf %23, %25 : vector<32x128xf32>
    %27 = vector.extract_strided_slice %3 {offsets = [0, 512], sizes = [32, 128], strides = [1, 1]} : vector<32x1152xf32> to vector<32x128xf32>
    %c30_i32 = arith.constant 30 : i32
    %28 = tpu.dynamic_rotate %27 by %c30_i32 dim 0 : vector<32x128xf32>, i32 -> vector<32x128xf32>
    %29 = arith.addf %26, %28 : vector<32x128xf32>
    %c14_i32 = arith.constant 14 : i32
    %30 = vector.broadcast %c14_i32 : i32 to vector<2x16x1xi32>
    %31 = arith.cmpi slt, %4, %30 : vector<2x16x1xi32>
    %32 = vector.shape_cast %29 : vector<32x128xf32> to vector<2x16x128xf32>
    %cst_12 = arith.constant 0xFF800000 : f32
    %33 = vector.shape_cast %31 : vector<2x16x1xi1> to vector<2x16x1xi1>
    %34 = vector.broadcast %33 : vector<2x16x1xi1> to vector<2x16x128xi1>
    %35 = vector.broadcast %cst_12 : f32 to vector<2x16x128xf32>
    %36 = arith.select %34, %32, %35 : vector<2x16x128xi1>, vector<2x16x128xf32>
    %cst_13 = arith.constant dense<0xFF800000> : vector<2x128xf32>
    %37 = vector.multi_reduction <maximumf>, %36, %cst_13 [1] : vector<2x16x128xf32> to vector<2x128xf32>
    %c0_14 = arith.constant 0 : index
    %c128 = arith.constant 128 : index
    %38 = vector.load %arg3[%c0_14, %c128] : memref<1x384xf32, #tpu.memory_space<vmem>>, vector<1x128xf32>
    %39 = vector.broadcast %38 : vector<1x128xf32> to vector<2x128xf32>
    %40 = arith.addf %37, %39 : vector<2x128xf32>
    %cst_15 = arith.constant 0.000000e+00 : f32
    %41 = vector.broadcast %cst_15 : f32 to vector<2x128xf32>
    %42 = arith.maximumf %40, %41 : vector<2x128xf32>
    %c0_16 = arith.constant 0 : index
    %c128_17 = arith.constant 128 : index
    %43 = vector.load %arg4[%c0_16, %c128_17] : memref<2x384xf32, #tpu.memory_space<vmem>>, vector<2x128xf32>
    tpu.vector_store %arg4[%c0_16, %c128_17], %42 {strides = array<i32>} : memref<2x384xf32, #tpu.memory_space<vmem>>, vector<2x128xf32>,
    %44 = vector.extract_strided_slice %3 {offsets = [0, 640], sizes = [32, 128], strides = [1, 1]} : vector<32x1152xf32> to vector<32x128xf32>
    %45 = vector.extract_strided_slice %3 {offsets = [0, 768], sizes = [32, 128], strides = [1, 1]} : vector<32x1152xf32> to vector<32x128xf32>
    %c31_i32_18 = arith.constant 31 : i32
    %46 = tpu.dynamic_rotate %45 by %c31_i32_18 dim 0 : vector<32x128xf32>, i32 -> vector<32x128xf32>
    %47 = arith.addf %44, %46 : vector<32x128xf32>
    %48 = vector.extract_strided_slice %3 {offsets = [0, 896], sizes = [32, 128], strides = [1, 1]} : vector<32x1152xf32> to vector<32x128xf32>
    %c30_i32_19 = arith.constant 30 : i32
    %49 = tpu.dynamic_rotate %48 by %c30_i32_19 dim 0 : vector<32x128xf32>, i32 -> vector<32x128xf32>
    %50 = arith.addf %47, %49 : vector<32x128xf32>
    %51 = vector.extract_strided_slice %3 {offsets = [0, 1024], sizes = [32, 128], strides = [1, 1]} : vector<32x1152xf32> to vector<32x128xf32>
    %c29_i32 = arith.constant 29 : i32
    %52 = tpu.dynamic_rotate %51 by %c29_i32 dim 0 : vector<32x128xf32>, i32 -> vector<32x128xf32>
    %53 = arith.addf %50, %52 : vector<32x128xf32>
    %c13_i32 = arith.constant 13 : i32
    %54 = vector.broadcast %c13_i32 : i32 to vector<2x16x1xi32>
    %55 = arith.cmpi slt, %4, %54 : vector<2x16x1xi32>
    %56 = vector.shape_cast %53 : vector<32x128xf32> to vector<2x16x128xf32>
    %cst_20 = arith.constant 0xFF800000 : f32
    %57 = vector.shape_cast %55 : vector<2x16x1xi1> to vector<2x16x1xi1>
    %58 = vector.broadcast %57 : vector<2x16x1xi1> to vector<2x16x128xi1>
    %59 = vector.broadcast %cst_20 : f32 to vector<2x16x128xf32>
    %60 = arith.select %58, %56, %59 : vector<2x16x128xi1>, vector<2x16x128xf32>
    %cst_21 = arith.constant dense<0xFF800000> : vector<2x128xf32>
    %61 = vector.multi_reduction <maximumf>, %60, %cst_21 [1] : vector<2x16x128xf32> to vector<2x128xf32>
    %c0_22 = arith.constant 0 : index
    %c256 = arith.constant 256 : index
    %62 = vector.load %arg3[%c0_22, %c256] : memref<1x384xf32, #tpu.memory_space<vmem>>, vector<1x128xf32>
    %63 = vector.broadcast %62 : vector<1x128xf32> to vector<2x128xf32>
    %64 = arith.addf %61, %63 : vector<2x128xf32>
    %cst_23 = arith.constant 0.000000e+00 : f32
    %65 = vector.broadcast %cst_23 : f32 to vector<2x128xf32>
    %66 = arith.maximumf %64, %65 : vector<2x128xf32>
    %c0_24 = arith.constant 0 : index
    %c256_25 = arith.constant 256 : index
    %67 = vector.load %arg4[%c0_24, %c256_25] : memref<2x384xf32, #tpu.memory_space<vmem>>, vector<2x128xf32>
    tpu.vector_store %arg4[%c0_24, %c256_25], %66 {strides = array<i32>} : memref<2x384xf32, #tpu.memory_space<vmem>>, vector<2x128xf32>,
    return
  }
  func.func @transform_0(%arg0: i32) -> (i32, i32, i32) {
    %c0_i32 = arith.constant 0 : i32
    %c0_i32_0 = arith.constant 0 : i32
    %c0_i32_1 = arith.constant 0 : i32
    return %arg0, %c0_i32, %c0_i32_0 : i32, i32, i32
  }
  func.func @transform_1(%arg0: i32) -> (i32, i32) {
    %c0_i32 = arith.constant 0 : i32
    %c0_i32_0 = arith.constant 0 : i32
    %c0_i32_1 = arith.constant 0 : i32
    return %c0_i32, %c0_i32_0 : i32, i32
  }
  func.func @transform_2(%arg0: i32) -> (i32, i32) {
    %c0_i32 = arith.constant 0 : i32
    %c0_i32_0 = arith.constant 0 : i32
    %c0_i32_1 = arith.constant 0 : i32
    return %c0_i32, %c0_i32_0 : i32, i32
  }
  func.func @transform_3(%arg0: i32) -> (i32, i32) {
    %c0_i32 = arith.constant 0 : i32
    %c0_i32_0 = arith.constant 0 : i32
    return %arg0, %c0_i32 : i32, i32
  }
}

</mosaic_0001>

<bundles_post_ra>
// kernel: tpu_custom_call.1
= control target key start
LH: loop header
LB: loop body
LE: loop exit
PB: predicated region body
PF: predicated region fallthrough
CT: control target
= control target key end

     0   :  { %8 = vsyncpa [#allocation3], 0  ;;  %s1162_s0 = inlined_call_operand.hbm [shape: f32[2,16,32], index: 0, kind: input, shape index: {}]   ;;  %s1163_s1 = inlined_call_operand.hbm [shape: f32[32,1152], index: 1, kind: input, shape index: {}]   ;;  %s1164_s2 = inlined_call_operand.vmem [shape: f32[1,384], index: 2, kind: input, shape index: {}]   ;;  %s1165_s3 = inlined_call_operand.hbm [shape: f32[2,384], index: 3, kind: output, shape index: {}]  }
   0x1   :  { %9 = vsyncpa [#allocation6], 0 }
   0x2   :  { %10 = vsyncpa [#allocation4], 0  ;;  %s945_s12 = smov [#allocation2]  }
   0x3   :  { %s16_s13 = sshll.u32 %s945_s12, 4  ;;  %s17_s13 = int_to_ptr.vmem [resolvable:$true] %s16_s13 }
   0x4   :  { %s887_s14 = scalar_lea.vmem %s17_s13, 512  ;;  %p892_p1 = scmp.lt.s32.totalorder %s17_s13, %s17_s13 }
   0x5   :  { %p888_p0 = scmp.ne.s32.totalorder %s17_s13, %s887_s14  ;;  %p893_p2 = scmp.lt.s32.totalorder %s887_s14, %s887_s14 }
   0x7   :  { %p894_p3 = por %p893_p2, %p892_p1 }
   0x9   :  { %p895_p4 = pnand %p894_p3, %p888_p0 }
   0xb   :  { %898 = shalt.err (!%p895_p4)
}
   0xc   :  { %s946_s15 = smov 128   ;;  %s947_s16 = smov 8  }
   0xd   :  { %22 = dma.hbm_to_vmem [thread:$0]  %s1162_s0, 512, %s17_s13, [#allocation3], %s946_s15, %s946_s15, %s947_s16  }
   0xe   :  { %s948_s19 = smov [#allocation5]  }
   0xf   :  { %s28_s20 = sshll.u32 %s948_s19, 4  ;;  %s29_s20 = int_to_ptr.vmem [resolvable:$true] %s28_s20 }
  0x10   :  { %s907_s21 = scalar_lea.vmem %s29_s20, 4608  ;;  %p912_p6 = scmp.lt.s32.totalorder %s29_s20, %s29_s20 }
  0x11   :  { %p908_p5 = scmp.ne.s32.totalorder %s29_s20, %s907_s21  ;;  %p913_p7 = scmp.lt.s32.totalorder %s907_s21, %s907_s21 }
  0x13   :  { %p914_p8 = por %p913_p7, %p912_p6 }
  0x15   :  { %p915_p9 = pnand %p914_p8, %p908_p5 }
  0x17   :  { %918 = shalt.err (!%p915_p9)
}
  0x18   :  { %s949_s22 = smov 1152   ;;  %s950_s23 = smov 72  }
  0x19   :  { %34 = dma.hbm_to_vmem [thread:$0]  %s1163_s1, 4608, %s29_s20, [#allocation6], %s949_s22, %s949_s22, %s950_s23  }
  0x1a   :  { %939 = dma.done.wait [#allocation3], 512  }
  0x1b   :  { %940 = vsyncadd [#allocation3], 4294966784 }
  0x1c   :  { %941 = dma.done.wait [#allocation6], 4608  }
  0x1d   :  { %942 = vsyncadd [#allocation6], 4294962688  ;;  %v951_v0 = vmov 0.0   ;;  %v75_v1 = vld [vmem:[#allocation5 + $0xe0] sm:$0xff]  ;;  %v77_v2 = vld [vmem:[#allocation5 + $0xf0] sm:$0xff]  ;;  %vm83_vm0 = vcmask 261120   ;;  %v537_v43 = vlaneseq }
  0x1e   :  { %160 = vmatprep.mubr.f32.mxu0 %v951_v0  ;;  %249 = vmatprep.mubr.f32.mxu1 %v951_v0  ;;  %v74_v3 = vld [vmem:[#allocation5 + $0xd8] sm:$0xff]  ;;  %v76_v4 = vld [vmem:[#allocation5 + $0xe8] sm:$0xff]  ;;  %v65_v7 = vld [vmem:[#allocation5 + $0x90] sm:$0xff]  ;;  %vm609_vm7 = vcmask 1041409   ;;  %vm611_vm8 = vcmask 1043459   ;;  %vm613_vm9 = vcmask 1045509  }
  0x1f   :  { %120 = vmatprep.subr.mxu0 %v75_v1  ;;  %209 = vmatprep.subr.mxu1 %v77_v2  ;;  %v66_v5 = vld [vmem:[#allocation5 + $0x98] sm:$0xff]  ;;  %v68_v6 = vld [vmem:[#allocation5 + $0xa8] sm:$0xff]  ;;  %v67_v8 = vld [vmem:[#allocation5 + $0xa0] sm:$0xff]  ;;  %v1041_v48 = vshrl.u32 %v537_v43, 7  ;;  %v952_v2 = vmov 1983009808  }
  0x20   :  { %121 = vmatpush1.msra.mxu0 %v74_v3  ;;  %210 = vmatpush1.msra.mxu1 %v76_v4  ;;  %v57_v9 = vld [vmem:[#allocation5 + $0x50] sm:$0xff]  ;;  %v59_v10 = vld [vmem:[#allocation5 + $0x60] sm:$0xff]  ;;  %v56_v11 = vld [vmem:[#allocation5 + $0x48] sm:$0xff]  ;;  %v591_v3 = vunpack.c.l.s4 %v952_v2  ;;  %vm615_vm10 = vcmask 1047559  }
  0x21   :  { %122 = vmatprep.subr.mxu0 %v66_v5  ;;  %211 = vmatprep.subr.mxu1 %v68_v6  ;;  %v58_v12 = vld [vmem:[#allocation5 + $0x58] sm:$0xff]  ;;  %v48_v13 = vld [vmem:[#allocation5 + $0x8] sm:$0xff]  ;;  %v47_v15 = vld [vmem:[#allocation5] sm:$0xff]  ;;  %vm544_vm1 = vcmp.lt.s32.totalorder %v1041_v48, 7  ;;  %v1047_v54 = vadd.s32 8, %v1041_v48  ;;  %vm635_vm3 = vcmp.lt.s32.totalorder %v1041_v48, 6 }
  0x22   :  { %123 = vmatpush1.msra.mxu0 %v65_v7  ;;  %212 = vmatpush1.msra.mxu1 %v67_v8  ;;  %v50_v14 = vld [vmem:[#allocation5 + $0x18] sm:$0xff]  ;;  %v49_v16 = vld [vmem:[#allocation5 + $0x10] sm:$0xff]  ;;  %v982_v17 = vld [vmem:[#allocation2] sm:$0xff]  ;;  %vm732_vm5 = vcmp.lt.s32.totalorder %v1041_v48, 5 }
  0x23   :  { %124 = vmatprep.subr.mxu0 %v57_v9  ;;  %213 = vmatprep.subr.mxu1 %v59_v10  ;;  %v79_v18 = vld [vmem:[#allocation5 + $0x100] sm:$0xff]  ;;  %v81_v19 = vld [vmem:[#allocation5 + $0x110] sm:$0xff]  ;;  %v78_v20 = vld [vmem:[#allocation5 + $0xf8] sm:$0xff]  ;;  %vm554_vm2 = vcmp.lt.s32.totalorder %v1047_v54, 15  ;;  %vm645_vm4 = vcmp.lt.s32.totalorder %v1047_v54, 14  ;;  %vm742_vm6 = vcmp.lt.s32.totalorder %v1047_v54, 13 }
  0x24   :  { %125 = vmatpush1.msra.mxu0 %v56_v11  ;;  %214 = vmatpush1.msra.mxu1 %v58_v12  ;;  %v80_v21 = vld [vmem:[#allocation5 + $0x108] sm:$0xff]  ;;  %v70_v23 = vld [vmem:[#allocation5 + $0xb8] sm:$0xff]  ;;  %v69_v25 = vld [vmem:[#allocation5 + $0xb0] sm:$0xff] }
  0x25   :  { %126 = vmatprep.subr.mxu0 %v48_v13  ;;  %215 = vmatprep.subr.mxu1 %v50_v14  ;;  %v988_v22 = vld [vmem:[#allocation2 + $0x8] sm:$0xff]  ;;  %v71_v26 = vld [vmem:[#allocation5 + $0xc0] sm:$0xff]  ;;  %v996_v27 = vld [vmem:[#allocation2 + $0x10] sm:$0xff] }
  0x26   :  { %127 = vmatpush1.msra.mxu0 %v47_v15  ;;  %216 = vmatpush1.msra.mxu1 %v49_v16  ;;  %v72_v24 = vld [vmem:[#allocation5 + $0xc8] sm:$0xff]  ;;  %v61_v28 = vld [vmem:[#allocation5 + $0x70] sm:$0xff]  ;;  %v63_v29 = vld [vmem:[#allocation5 + $0x80] sm:$0xff] }
  0x27   :  { %817 = vmatmul.mubr.msk.f32.vlgmr.msra.gmra.mxu0 %vm83_vm0, %v982_v17  ;;  %821 = vmatmul.mubr.msk.f32.vlgmr.msra.gmra.mxu1 %vm83_vm0, %v982_v17  ;;  %v60_v30 = vld [vmem:[#allocation5 + $0x68] sm:$0xff]  ;;  %v62_v31 = vld [vmem:[#allocation5 + $0x78] sm:$0xff]  ;;  %v51_v35 = vld [vmem:[#allocation5 + $0x20] sm:$0xff] }
  0x28   :  { %298 = vmatprep.subr.mxu0 %v79_v18  ;;  %387 = vmatprep.subr.mxu1 %v81_v19  ;;  %v46_v32 = vld [vmem:[#allocation2 + $0x18] sm:$0xff]  ;;  %v52_v33 = vld [vmem:[#allocation5 + $0x28] sm:$0xff]  ;;  %v53_v36 = vld [vmem:[#allocation5 + $0x30] sm:$0xff]  ;;  %v592_v19 = vunpack.c.0.s8 %v591_v3 }
  0x29   :  { %299 = vmatpush1.msra.mxu0 %v78_v20  ;;  %388 = vmatpush1.msra.mxu1 %v80_v21  ;;  %v54_v34 = vld [vmem:[#allocation5 + $0x38] sm:$0xff]  ;;  %v73_v38 = vld [vmem:[#allocation5 + $0xd0] sm:$0xff]  ;;  %v64_v39 = vld [vmem:[#allocation5 + $0x88] sm:$0xff] }
  0x2a   :  { %166 = vmatprep.mubr.f32.mxu0 %v951_v0  ;;  %255 = vmatprep.mubr.f32.mxu1 %v951_v0  ;;  %v82_v37 = vld [vmem:[#allocation5 + $0x118] sm:$0xff]  ;;  %v55_v40 = vld [vmem:[#allocation5 + $0x40] sm:$0xff] }
  0x2b   :  { %818 = vmatmul.mubr.msk.f32.gmra.mxu0 %vm83_vm0, %v988_v22  ;;  %822 = vmatmul.mubr.msk.f32.gmra.mxu1 %vm83_vm0, %v988_v22 }
  0x2c   :  { %300 = vmatprep.subr.mxu0 %v70_v23  ;;  %389 = vmatprep.subr.mxu1 %v72_v24 }
  0x2d   :  { %301 = vmatpush1.msra.mxu0 %v69_v25  ;;  %390 = vmatpush1.msra.mxu1 %v71_v26 }
  0x2e   :  { %172 = vmatprep.mubr.f32.mxu0 %v951_v0  ;;  %261 = vmatprep.mubr.f32.mxu1 %v951_v0 }
  0x2f   :  { %819 = vmatmul.mubr.msk.f32.gmra.mxu0 %vm83_vm0, %v996_v27  ;;  %823 = vmatmul.mubr.msk.f32.gmra.mxu1 %vm83_vm0, %v996_v27 }
  0x30   :  { %302 = vmatprep.subr.mxu0 %v61_v28  ;;  %391 = vmatprep.subr.mxu1 %v63_v29 }
  0x31   :  { %303 = vmatpush1.msra.mxu0 %v60_v30  ;;  %392 = vmatpush1.msra.mxu1 %v62_v31 }
  0x32   :  { %178 = vmatprep.mubr.f32.mxu0 %v951_v0  ;;  %267 = vmatprep.mubr.f32.mxu1 %v951_v0 }
  0x33   :  { %820 = vmatmul.mubr.msk.f32.gmra.mxu0 %vm83_vm0, %v46_v32  ;;  %824 = vmatmul.mubr.msk.f32.gmra.mxu1 %vm83_vm0, %v46_v32 }
  0x34   :  { %304 = vmatprep.subr.mxu0 %v52_v33  ;;  %393 = vmatprep.subr.mxu1 %v54_v34 }
  0x35   :  { %305 = vmatpush1.msra.mxu0 %v51_v35  ;;  %394 = vmatpush1.msra.mxu1 %v53_v36  ;;  %v1080_v35 = vsub.s32 %v592_v19, %v1041_v48 }
  0x36   :  { %338 = vmatprep.mubr.f32.mxu0 %v951_v0  ;;  %427 = vmatprep.mubr.f32.mxu1 %v951_v0 }
  0x37   :  { %825 = vmatmul.mubr.msk.f32.vlgmr.msra.gmra.mxu0 %vm83_vm0, %v982_v17  ;;  %829 = vmatmul.mubr.msk.f32.vlgmr.msra.gmra.mxu1 %vm83_vm0, %v982_v17 }
  0x38   :  { %848 = vmatprep.subr.mxu0 %v82_v37  ;;  %862 = vmatprep.subr.mxu1 %v82_v37 }
  0x39   :  { %849 = vmatpush3.msra.mxu0 %v82_v37  ;;  %866 = vmatpush3.msra.mxu1 %v82_v37 }
  0x3a   :  { %344 = vmatprep.mubr.f32.mxu0 %v951_v0  ;;  %433 = vmatprep.mubr.f32.mxu1 %v951_v0 }
  0x3b   :  { %826 = vmatmul.mubr.msk.f32.gmra.mxu0 %vm83_vm0, %v988_v22  ;;  %830 = vmatmul.mubr.msk.f32.gmra.mxu1 %vm83_vm0, %v988_v22 }
  0x3c   :  { %850 = vmatprep.subr.mxu0 %v73_v38  ;;  %863 = vmatprep.subr.mxu1 %v73_v38 }
  0x3d   :  { %851 = vmatpush3.msra.mxu0 %v73_v38  ;;  %867 = vmatpush3.msra.mxu1 %v73_v38 }
  0x3e   :  { %350 = vmatprep.mubr.f32.mxu0 %v951_v0  ;;  %439 = vmatprep.mubr.f32.mxu1 %v951_v0 }
  0x3f   :  { %827 = vmatmul.mubr.msk.f32.gmra.mxu0 %vm83_vm0, %v996_v27  ;;  %831 = vmatmul.mubr.msk.f32.gmra.mxu1 %vm83_vm0, %v996_v27 }
  0x40   :  { %852 = vmatprep.subr.mxu0 %v64_v39  ;;  %864 = vmatprep.subr.mxu1 %v64_v39 }
  0x41   :  { %853 = vmatpush3.msra.mxu0 %v64_v39  ;;  %868 = vmatpush3.msra.mxu1 %v64_v39 }
  0x42   :  { %356 = vmatprep.mubr.f32.mxu0 %v951_v0  ;;  %445 = vmatprep.mubr.f32.mxu1 %v951_v0 }
  0x43   :  { %828 = vmatmul.mubr.msk.f32.gmra.mxu0 %vm83_vm0, %v46_v32  ;;  %832 = vmatmul.mubr.msk.f32.gmra.mxu1 %vm83_vm0, %v46_v32 }
  0x44   :  { %854 = vmatprep.subr.mxu0 %v55_v40  ;;  %865 = vmatprep.subr.mxu1 %v55_v40 }
  0x45   :  { %855 = vmatpush3.msra.mxu0 %v55_v40  ;;  %869 = vmatpush3.msra.mxu1 %v55_v40 }
  0x46   :  { %856 = vmatprep.mubr.msk.f32.mxu0 %vm83_vm0, %v982_v17  ;;  %859 = vmatprep.mubr.msk.f32.mxu1 %vm83_vm0, %v996_v27 }
  0x47   :  { %857 = vmatmul.mubr.msk.f32.vlgmr.msra.gmra.mxu0 %vm83_vm0, %v988_v22  ;;  %860 = vmatmul.mubr.msk.f32.vlgmr.msra.gmra.mxu1 %vm83_vm0, %v46_v32 }
  0xe7   :  { %v162_v41 = vpop.f32.mrf.mxu0  ;;  %v1037_v42 = vpop.f32.mrf.mxu1 }
  0xe9   :  { %v164_v44 = vpop.f32.mrf.mxu0  ;;  %v1039_v45 = vpop.f32.mrf.mxu1 }
  0xea   :  { %v540_v55 = vrot.slane %v164_v44, 1  ;;  %v619_v14 = vrot.slane %v1039_v45, 1 }
  0xeb   :  { %v168_v46 = vpop.f32.mrf.mxu0  ;;  %v257_v47 = vpop.f32.mrf.mxu1 }
  0xed   :  { %v170_v49 = vpop.f32.mrf.mxu0  ;;  %v259_v50 = vpop.f32.mrf.mxu1 }
  0xee   :  { %v541_v51 = vrot.slane %v170_v49, 1  ;;  %v620_v6 = vrot.slane %v259_v50, 1 }
  0xef   :  { %v174_v52 = vpop.f32.mrf.mxu0  ;;  %v1043_v53 = vpop.f32.mrf.mxu1 }
  0xf0   :  { %v547_v59 = vsel %vm544_vm1, %v540_v55, %v541_v51  ;;  %v625_v22 = vsel %vm544_vm1, %v619_v14, %v620_v6 }
  0xf1   :  { %v176_v56 = vpop.f32.mrf.mxu0  ;;  %v265_v57 = vpop.f32.mrf.mxu1  ;;  %v549_v4 = vadd.f32 %v547_v59, %v162_v41  ;;  %v627_v40 = vadd.f32 %v625_v22, %v1037_v42 }
  0xf2   :  { %v542_v58 = vrot.slane %v176_v56, 1  ;;  %v621_v8 = vrot.slane %v265_v57, 1 }
  0xf3   :  { %v180_v60 = vpop.f32.mrf.mxu0  ;;  %v1051_v61 = vpop.f32.mrf.mxu1 }
  0xf4   :  { %v546_v62 = vsel %vm544_vm1, %v541_v51, %v542_v58  ;;  %v624_v23 = vsel %vm544_vm1, %v620_v6, %v621_v8 }
  0xf5   :  { %v550_v63 = vadd.f32 %v546_v62, %v168_v46  ;;  %v182_v0 = vpop.f32.mrf.mxu0  ;;  %v271_v1 = vpop.f32.mrf.mxu1  ;;  %v628_v41 = vadd.f32 %v624_v23, %v257_v47 }
  0xf6   :  { %v543_v5 = vrot.slane %v182_v0, 1  ;;  %v622_v21 = vrot.slane %v271_v1, 1  ;;  %v837_v0 = vld [vmem:[%s1164_s2] ss:$0 sm:$0xff] }
  0xf7   :  { %v560_v7 = vsel %vm554_vm2, %v550_v63, -inf  ;;  %v1058_v9 = vpop.f32.mrf.mxu0  ;;  %v1060_v10 = vpop.f32.mrf.mxu1 }
  0xf8   :  { %v563_v11 = vmax.f32 %v549_v4, %v560_v7  ;;  %v545_v12 = vsel %vm544_vm1, %v542_v58, %v543_v5  ;;  %v548_v13 = vsel %vm544_vm1, %v543_v5, %v540_v55  ;;  %v631_v25 = vrot.slane %v1058_v9, 2 }
  0xf9   :  { %v551_v15 = vadd.f32 %v545_v12, %v174_v52  ;;  %v552_v16 = vadd.f32 %v548_v13, %v180_v60  ;;  %v342_v17 = vpop.f32.mrf.mxu0  ;;  %v1067_v18 = vpop.f32.mrf.mxu1  ;;  %v704_v32 = vrot.slane %v1060_v10, 1  ;;  %v623_v38 = vsel %vm544_vm1, %v621_v8, %v622_v21 }
  0xfa   :  { %v564_v20 = vrot.slane %v563_v11, 4  ;;  %v626_v55 = vsel %vm544_vm1, %v622_v21, %v619_v14  ;;  %v629_v56 = vadd.f32 %v623_v38, %v1043_v53  ;;  %v716_v57 = vrot.slane %v1067_v18, 2 }
  0xfb   :  { %v562_v24 = vsel %vm554_vm2, %v552_v16, -inf  ;;  %v346_v26 = vpop.f32.mrf.mxu0  ;;  %v435_v27 = vpop.f32.mrf.mxu1  ;;  %v630_v10 = vadd.f32 %v626_v55, %v1051_v61 }
  0xfc   :  { %v565_v28 = vmax.f32 %v563_v11, %v564_v20  ;;  %v570_v29 = vmax.f32 %v551_v15, %v562_v24  ;;  %v632_v30 = vrot.slane %v346_v26, 2  ;;  %v705_v31 = vrot.slane %v435_v27, 1 }
  0xfd   :  { %v348_v33 = vpop.f32.mrf.mxu0  ;;  %v437_v34 = vpop.f32.mrf.mxu1 }
  0xfe   :  { %v566_v36 = vrot.slane %v565_v28, 2  ;;  %v571_v37 = vrot.slane %v570_v29, 4  ;;  %v638_v39 = vsel %vm635_vm3, %v631_v25, %v632_v30  ;;  %v710_v43 = vsel %vm544_vm1, %v704_v32, %v705_v31 }
  0xff   :  { %v717_v44 = vrot.slane %v437_v34, 2  ;;  %v352_v45 = vpop.f32.mrf.mxu0  ;;  %v441_v46 = vpop.f32.mrf.mxu1  ;;  %v640_v58 = vadd.f32 %v638_v39, %v627_v40  ;;  %v712_v62 = vadd.f32 %v710_v43, %v342_v17 }
 0x100   :  { %v567_v49 = vmax.f32 %v565_v28, %v566_v36  ;;  %v572_v50 = vmax.f32 %v570_v29, %v571_v37  ;;  %v633_v51 = vrot.slane %v352_v45, 2  ;;  %v706_v52 = vrot.slane %v441_v46, 1 }
 0x101   :  { %v354_v42 = vpop.f32.mrf.mxu0  ;;  %v443_v47 = vpop.f32.mrf.mxu1  ;;  %v722_v53 = vsel %vm635_vm3, %v716_v57, %v717_v44 }
 0x102   :  { %v568_v59 = vrot.slane %v567_v49, 1  ;;  %v573_v60 = vrot.slane %v572_v50, 2  ;;  %v637_v63 = vsel %vm635_vm3, %v632_v30, %v633_v51  ;;  %v709_v2 = vsel %vm544_vm1, %v705_v31, %v706_v52 }
 0x103   :  { %v641_v1 = vadd.f32 %v637_v63, %v628_v41  ;;  %v718_v3 = vrot.slane %v443_v47, 2  ;;  %v358_v4 = vpop.f32.mrf.mxu0  ;;  %v447_v5 = vpop.f32.mrf.mxu1  ;;  %v713_v8 = vadd.f32 %v709_v2, %v348_v33  ;;  %v724_v18 = vadd.f32 %v722_v53, %v712_v62 }
 0x104   :  { %v569_v6 = vmax.f32 %v567_v49, %v568_v59  ;;  %v574_v7 = vmax.f32 %v572_v50, %v573_v60  ;;  %v634_v9 = vrot.slane %v358_v4, 2  ;;  %v707_v13 = vrot.slane %v447_v5, 1 }
 0x105   :  { %v651_v11 = vsel %vm645_vm4, %v641_v1, -inf  ;;  %v721_v12 = vsel %vm635_vm3, %v717_v44, %v718_v3  ;;  %v360_v14 = vpop.f32.mrf.mxu0  ;;  %v449_v15 = vpop.f32.mrf.mxu1 }
 0x106   :  { %v584_v16 = vadd.f32 %v837_v0, %v569_v6  ;;  %v575_v17 = vrot.slane %v574_v7, 1  ;;  %v654_v19 = vmax.f32 %v640_v58, %v651_v11  ;;  %v636_v20 = vsel %vm635_vm3, %v633_v51, %v634_v9 }
 0x107   :  { %v639_v61 = vsel %vm635_vm3, %v634_v9, %v631_v25  ;;  %v708_v21 = vsel %vm544_vm1, %v706_v52, %v707_v13  ;;  %v711_v22 = vsel %vm544_vm1, %v707_v13, %v704_v32  ;;  %v858_v23 = vpop.f32.mrf.mxu0  ;;  %v861_v24 = vpop.f32.mrf.mxu1  ;;  %v725_v28 = vadd.f32 %v721_v12, %v713_v8 }
 0x108   :  { %v576_v26 = vmax.f32 %v574_v7, %v575_v17  ;;  %v655_v27 = vrot.slane %v654_v19, 4  ;;  %v642_v29 = vadd.f32 %v636_v20, %v629_v56  ;;  %v643_v30 = vadd.f32 %v639_v61, %v630_v10 }
 0x109   :  { %v714_v31 = vadd.f32 %v708_v21, %v354_v42  ;;  %v715_v33 = vadd.f32 %v711_v22, %v360_v14  ;;  %v719_v34 = vrot.slane %v449_v15, 2  ;;  %v518_v36 = vpop.f32.mrf.mxu0  ;;  %v729_v38 = vrot.slane %v858_v23, 3  ;;  %v528_v40 = vpop.f32.mrf.mxu1  ;;  %v838_v14 = vld [vmem:[%s1164_s2 + $0x1] ss:$0 sm:$0xff] }
 0x10a   :  { %v585_v37 = vadd.f32 %v837_v0, %v576_v26  ;;  %v656_v25 = vmax.f32 %v654_v19, %v655_v27  ;;  %v731_v39 = vrot.slane %v861_v24, 3  ;;  %v653_v32 = vsel %vm645_vm4, %v643_v30, -inf }
 0x10b   :  { %v720_v41 = vsel %vm635_vm3, %v718_v3, %v719_v34  ;;  %v723_v43 = vsel %vm635_vm3, %v719_v34, %v716_v57  ;;  %v728_v44 = vrot.slane %v518_v36, 3  ;;  %v586_v45 = vmax.f32 %v584_v16, 0.0 }
 0x10c   :  { %v587_v46 = vmax.f32 %v585_v37, 0.0  ;;  %v657_v49 = vrot.slane %v656_v25, 2  ;;  %v661_v50 = vmax.f32 %v642_v29, %v653_v32  ;;  %v727_v51 = vadd.f32 %v723_v43, %v715_v33 }
 0x10d   :  { %v735_v52 = vsel %vm732_vm5, %v728_v44, %v729_v38  ;;  %v736_v55 = vsel %vm732_vm5, %v731_v39, %v728_v44  ;;  %v730_v56 = vrot.slane %v528_v40, 3  ;;  %v726_v47 = vadd.f32 %v720_v41, %v714_v31  ;;  %v839_v31 = vld [vmem:[%s1164_s2 + $0x2] ss:$0 sm:$0xff]  ;;  %s953_s2 = smov [#allocation7]  }
 0x10e   :  { %v658_v58 = vmax.f32 %v656_v25, %v657_v49  ;;  %v662_v42 = vrot.slane %v661_v50, 4  ;;  %v737_v59 = vadd.f32 %v735_v52, %v724_v18  ;;  %v740_v60 = vadd.f32 %v736_v55, %v727_v51  ;;  %s807_s30 = sshll.u32 %s953_s2, 4  ;;  %s808_s30 = int_to_ptr.vmem [resolvable:$true] %s807_s30 }
 0x10f   :  { %v733_v57 = vsel %vm732_vm5, %v730_v56, %v731_v39  ;;  %v734_v62 = vsel %vm732_vm5, %v729_v38, %v730_v56  ;;  %v603_v63 = vrot.slane %v587_v46, %v1080_v35  ;;  %v596_v4 = vrot.slane %v586_v45, %v1080_v35  ;;  %s919_s4 = scalar_lea.vmem %s808_s30, 96  ;;  %p924_p11 = scmp.lt.s32.totalorder %s808_s30, %s808_s30 }
 0x110   :  { %v659_v0 = vrot.slane %v658_v58, 1  ;;  %v663_v53 = vmax.f32 %v661_v50, %v662_v42  ;;  %v738_v1 = vadd.f32 %v734_v62, %v725_v28  ;;  %v739_v2 = vadd.f32 %v733_v57, %v726_v47  ;;  %p920_p10 = scmp.ne.s32.totalorder %s808_s30, %s919_s4  ;;  %p925_p12 = scmp.lt.s32.totalorder %s919_s4, %s919_s4 }
 0x111   :  { %v750_v3 = vsel %vm742_vm6, %v740_v60, -inf  ;;  %v608_v5 = vrot.slane %v603_v63, 7 }
 0x112   :  { %v664_v6 = vrot.slane %v663_v53, 2  ;;  %v748_v7 = vsel %vm742_vm6, %v738_v1, -inf  ;;  %v758_v8 = vmax.f32 %v739_v2, %v750_v3  ;;  %v660_v10 = vmax.f32 %v658_v58, %v659_v0  ;;  %p926_p13 = por %p925_p12, %p924_p11 }
 0x113   :  { %v751_v48 = vmax.f32 %v737_v59, %v748_v7  ;;  %v610_v9 = vsel %vm609_vm7, %v608_v5, %v596_v4 }
 0x114   :  { %v665_v11 = vmax.f32 %v663_v53, %v664_v6  ;;  %v759_v12 = vrot.slane %v758_v8, 4  ;;  %v612_v13 = vsel %vm611_vm8, %v608_v5, %v610_v9  ;;  %v675_v20 = vadd.f32 %v838_v14, %v660_v10  ;;  %p927_p0 = pnand %p926_p13, %p920_p10 }
 0x115   :  { %v752_v15 = vrot.slane %v751_v48, 4  ;;  %v614_v16 = vsel %vm613_vm9, %v608_v5, %v612_v13 }
 0x116   :  { %v666_v54 = vrot.slane %v665_v11, 1  ;;  %v760_v17 = vmax.f32 %v758_v8, %v759_v12  ;;  %v616_v18 = vsel %vm615_vm10, %v608_v5, %v614_v16  ;;  %v677_v27 = vmax.f32 %v675_v20, 0.0 }
 0x117   :  { %v753_v19 = vmax.f32 %v751_v48, %v752_v15  ;;  %618 = vst [vmem:[#allocation7] sm:$0x3] %v616_v18 }
 0x118   :  { %v667_v61 = vmax.f32 %v665_v11, %v666_v54  ;;  %v761_v21 = vrot.slane %v760_v17, 2  ;;  %v687_v25 = vrot.slane %v677_v27, %v1080_v35 }
 0x119   :  { %v754_v22 = vrot.slane %v753_v19, 2 }
 0x11a   :  { %v676_v23 = vadd.f32 %v838_v14, %v667_v61  ;;  %v762_v24 = vmax.f32 %v760_v17, %v761_v21 }
 0x11b   :  { %v755_v26 = vmax.f32 %v753_v19, %v754_v22 }
 0x11c   :  { %v678_v28 = vmax.f32 %v676_v23, 0.0  ;;  %v763_v29 = vrot.slane %v762_v24, 1 }
 0x11d   :  { %v756_v30 = vrot.slane %v755_v26, 1 }
 0x11e   :  { %v764_v33 = vmax.f32 %v762_v24, %v763_v29  ;;  %v694_v34 = vrot.slane %v678_v28, %v1080_v35 }
 0x11f   :  { %v757_v36 = vmax.f32 %v755_v26, %v756_v30 }
 0x120   :  { %v773_v37 = vadd.f32 %v839_v31, %v764_v33  ;;  %v697_v38 = vrot.slane %v694_v34, 7 }
 0x121   :  { %v772_v39 = vadd.f32 %v839_v31, %v757_v36 }
 0x122   :  { %v775_v40 = vmax.f32 %v773_v37, 0.0  ;;  %v698_v32 = vsel %vm609_vm7, %v697_v38, %v687_v25 }
 0x123   :  { %v774_v41 = vmax.f32 %v772_v39, 0.0  ;;  %v699_v43 = vsel %vm611_vm8, %v697_v38, %v698_v32 }
 0x124   :  { %v700_v44 = vsel %vm613_vm9, %v697_v38, %v699_v43  ;;  %v791_v45 = vrot.slane %v775_v40, %v1080_v35 }
 0x125   :  { %v701_v46 = vsel %vm615_vm10, %v697_v38, %v700_v44  ;;  %v784_v49 = vrot.slane %v774_v41, %v1080_v35 }
 0x126   :  { %703 = vst [vmem:[#allocation7 + $0x2] sm:$0x3] %v701_v46  ;;  %v794_v50 = vrot.slane %v791_v45, 7 }
 0x128   :  { %v795_v51 = vsel %vm609_vm7, %v794_v50, %v784_v49 }
 0x129   :  { %v796_v52 = vsel %vm611_vm8, %v794_v50, %v795_v51 }
 0x12a   :  { %v797_v55 = vsel %vm613_vm9, %v794_v50, %v796_v52 }
 0x12b   :  { %v798_v56 = vsel %vm615_vm10, %v794_v50, %v797_v55 }
 0x12c   :  { %800 = vst [vmem:[#allocation7 + $0x4] sm:$0x3] %v798_v56 }
 0x12d   :  { %930 = shalt.err (!%p927_p0)
}
 0x12e   :  { %810 = dma.vmem_to_hbm [thread:$0]  %s808_s30, 96, %s1165_s3, [#allocation4]  }
 0x12f   :  { %943 = dma.done.wait [#allocation4], 96  }
 0x130   :  { %944 = vsyncadd [#allocation4], 4294967200 }
 0x131   :  { %814 = vsyncpa [#allocation3], 1 }
 0x132   :  { %815 = vsyncpa [#allocation6], 1 }
 0x133   :  { %816 = vsyncpa [#allocation4], 1 }

</bundles_post_ra>
